<compile_context>
chip_gen: v5e
topology: v5e:2x2
jax: 0.10.0
libtpu: 0.0.40
codegen_flags: <defaults>
</compile_context>

<pallas_src>
import jax
import jax.numpy as jnp
from jax.experimental import pallas as pl
from jax.experimental.pallas import tpu as pltpu

EPS = 1e-5  # nn.InstanceNorm2d default eps


def _pick_batch_block(n, max_block=8):
    """Batch as many images per grid step as possible while keeping >=2 grid steps."""
    if n <= 2:
        return 1
    best = 1
    for b in range(1, min(max_block, n // 2) + 1):
        if n % b == 0:
            best = b
    return best


def conv_module_forward(x_nchw, weight_oihw, bias=None, kernel_size=3):
    """Pallas implementation of ConvModule.forward. x_nchw: (N, Cin, H, W) -> (N, Cout, H, W)."""
    N, Cin, H, W = x_nchw.shape
    Cout = weight_oihw.shape[0]
    K = kernel_size
    assert K % 2 == 1, "ConvModule uses 'same' padding (odd kernel)"
    pad = K // 2
    HW = H * W
    KK = K * K
    HWp = (H + 2 * pad) * W + 2 * pad  # flat padded spatial length per channel

    # Conv bias is mathematically cancelled by InstanceNorm2d(affine=False); drop it.
    del bias

    B = _pick_batch_block(N)
    NB = N // B

    # --- XLA glue (cheap): pad H only, flatten spatial, guard flat ends by `pad`. ---
    x_pad = jnp.pad(x_nchw, ((0, 0), (0, 0), (pad, pad), (0, 0)))
    x_flat = x_pad.reshape(N, Cin, (H + 2 * pad) * W)
    x_flat = jnp.pad(x_flat, ((0, 0), (0, 0), (pad, pad)))          # (N, Cin, HWp)

    # Weights: (Cout, Cin, K, K) -> (K*K, Cout, Cin), tap-major so kernel indexes w_ref[t].
    w_taps = jnp.transpose(weight_oihw, (2, 3, 0, 1)).reshape(KK, Cout, Cin)

    # Horizontal validity masks per kx (vertical padding is explicit zeros already).
    col = jnp.arange(HW, dtype=jnp.int32) % W
    mask_rows = []
    for kx in range(K):
        valid = (col >= (pad - kx)) & (col <= (W - 1 + pad - kx))
        mask_rows.append(valid.astype(x_nchw.dtype))
    col_mask = jnp.stack(mask_rows, axis=0)                          # (K, HW)

    inv_hw = 1.0 / float(HW)

    def kernel(w_ref, m_ref, x_ref, o_ref):
        # w_ref: (K*K, Cout, Cin) resident weights
        # m_ref: (K, HW)          resident horizontal masks
        # x_ref: (B, Cin, HWp)    flat padded images for this batch block
        # o_ref: (B, Cout, HW)    lane-dense output slab
        masks = [m_ref[kx:kx + 1, :] for kx in range(K)]             # hoisted (1, HW) rows
        for b in range(B):
            xb = x_ref[b]                                            # (Cin, HWp)
            acc = jnp.zeros((Cout, HW), jnp.float32)
            for t in range(KK):
                ky, kx = divmod(t, K)
                start = ky * W + kx                                  # constant flat offset
                tap = xb[:, start:start + HW]                        # (Cin, HW)
                if kx != pad:                                        # edge columns -> zero
                    tap = tap * masks[kx]
                acc = acc + jnp.dot(w_ref[t], tap,
                                    preferred_element_type=jnp.float32)

            # InstanceNorm2d (affine=False): one-pass per-channel stats over H*W (f32).
            s1 = jnp.sum(acc, axis=1, keepdims=True)                 # (Cout, 1)
            s2 = jnp.sum(acc * acc, axis=1, keepdims=True)
            mean = s1 * inv_hw
            var = jnp.maximum(s2 * inv_hw - mean * mean, 0.0)
            z = (acc - mean) * jax.lax.rsqrt(var + EPS)

            # Smish: z*tanh(log1p(sigmoid(z))) == z*(s^2+2s)/(s^2+2s+2)  (exact divide)
            s = 1.0 / (1.0 + jnp.exp(-z))
            u = s * (s + 2.0)
            o_ref[b] = (z * u / (u + 2.0)).astype(o_ref.dtype)

    cost = pl.CostEstimate(
        flops=2 * N * Cout * Cin * KK * HW,
        transcendentals=N * Cout * HW,
        bytes_accessed=4 * (N * Cin * HWp + KK * Cout * Cin + K * HW + N * Cout * HW),
    )

    out = pl.pallas_call(
        kernel,
        out_shape=jax.ShapeDtypeStruct((N, Cout, HW), x_nchw.dtype),
        grid_spec=pltpu.PrefetchScalarGridSpec(
            num_scalar_prefetch=0,
            grid=(NB,),
            in_specs=[
                pl.BlockSpec((KK, Cout, Cin), lambda n: (0, 0, 0)),  # weights, resident
                pl.BlockSpec((K, HW), lambda n: (0, 0)),             # masks, resident
                pl.BlockSpec((B, Cin, HWp), lambda n: (n, 0, 0)),    # B images per step
            ],
            out_specs=pl.BlockSpec((B, Cout, HW), lambda n: (n, 0, 0)),
        ),
        compiler_params=pltpu.CompilerParams(
            dimension_semantics=("parallel",)),
        cost_estimate=cost,
    )(w_taps, col_mask, x_flat)

    # Already channel-major; fold H*W back into (H, W) -> NCHW.
    return out.reshape(N, Cout, H, W)


def reference_forward(x_nchw, weight_oihw, bias):
    """Pure-JAX reference mirroring the PyTorch module (conv WITH bias, exact Smish)."""
    out = jax.lax.conv_general_dilated(
        x_nchw, weight_oihw, window_strides=(1, 1), padding="SAME",
        dimension_numbers=("NCHW", "OIHW", "NCHW"))
    out = out + bias.reshape(1, -1, 1, 1)
    mean = jnp.mean(out, axis=(2, 3), keepdims=True)
    var = jnp.mean(jnp.square(out - mean), axis=(2, 3), keepdims=True)
    z = (out - mean) / jnp.sqrt(var + EPS)
    return z * jnp.tanh(jnp.log1p(jax.nn.sigmoid(z)))


if __name__ == "__main__":
    # Small, deterministic setup consistent with ConvModule(in_channels=4, out_channels=8)
    N, Cin, Cout, H, W, K = 2, 4, 8, 16, 16, 3

    key = jax.random.PRNGKey(0)
    kx_, kw_, kb_ = jax.random.split(key, 3)

    x = jax.random.normal(kx_, (N, Cin, H, W), dtype=jnp.float32)

    # Deterministic init matching nn.Conv2d parameter shapes: weight (Cout,Cin,K,K), bias (Cout,)
    fan_in = Cin * K * K
    bound = 1.0 / (fan_in ** 0.5)
    weight = jax.random.uniform(kw_, (Cout, Cin, K, K), jnp.float32, -bound, bound)
    bias = jax.random.uniform(kb_, (Cout,), jnp.float32, -bound, bound)

    out = conv_module_forward(x, weight, bias, kernel_size=K)
    out = jax.block_until_ready(out)

    ref = reference_forward(x, weight, bias)
    assert out.shape == (N, Cout, H, W), out.shape
    max_err = float(jnp.max(jnp.abs(out - ref)))
    assert jnp.allclose(out, ref, atol=1e-3, rtol=1e-3), max_err

    print("KERNEL_OK")
</pallas_src>

<mosaic_0001>
module attributes {stable_mosaic.version = 11 : i64} {
  func.func @kernel(%arg0: i32, %arg1: memref<9x8x4xf32, #tpu.memory_space<vmem>>, %arg2: memref<3x256xf32, #tpu.memory_space<vmem>>, %arg3: memref<1x4x290xf32, #tpu.memory_space<vmem>>, %arg4: memref<1x8x256xf32, #tpu.memory_space<vmem>>) attributes {dimension_semantics = [#tpu.dimension_semantics<parallel>], iteration_bounds = array<i64: 2>, scalar_prefetch = 0 : i64, scratch_operands = 0 : i64, tpu.core_type = #tpu.core_type<tc>, window_params = [{pipeline_mode = #tpu.pipeline_mode<synchronous>, transform_indices = @transform_0, window_bounds = array<i64: 9, 8, 4>}, {pipeline_mode = #tpu.pipeline_mode<synchronous>, transform_indices = @transform_1, window_bounds = array<i64: 3, 256>}, {transform_indices = @transform_2, window_bounds = array<i64: 1, 4, 290>}, {transform_indices = @transform_3, window_bounds = array<i64: 1, 8, 256>}]} {
    %c0 = arith.constant 0 : index
    %c0_0 = arith.constant 0 : index
    %0 = vector.load %arg2[%c0, %c0_0] : memref<3x256xf32, #tpu.memory_space<vmem>>, vector<1x256xf32>
    %c2 = arith.constant 2 : index
    %c0_1 = arith.constant 0 : index
    %1 = vector.load %arg2[%c2, %c0_1] : memref<3x256xf32, #tpu.memory_space<vmem>>, vector<1x256xf32>
    %c0_2 = arith.constant 0 : index
    %c0_3 = arith.constant 0 : index
    %c0_4 = arith.constant 0 : index
    %2 = vector.load %arg3[%c0_2, %c0_3, %c0_4] : memref<1x4x290xf32, #tpu.memory_space<vmem>>, vector<1x4x290xf32>
    %3 = vector.shape_cast %2 : vector<1x4x290xf32> to vector<4x290xf32>
    %cst = arith.constant 0.000000e+00 : f32
    %4 = vector.broadcast %cst : f32 to vector<8x256xf32>
    %5 = vector.extract_strided_slice %3 {offsets = [0, 0], sizes = [4, 256], strides = [1, 1]} : vector<4x290xf32> to vector<4x256xf32>
    %6 = vector.broadcast %0 : vector<1x256xf32> to vector<4x256xf32>
    %7 = arith.mulf %5, %6 : vector<4x256xf32>
    %c0_5 = arith.constant 0 : index
    %c0_6 = arith.constant 0 : index
    %c0_7 = arith.constant 0 : index
    %8 = vector.load %arg1[%c0_5, %c0_6, %c0_7] : memref<9x8x4xf32, #tpu.memory_space<vmem>>, vector<1x8x4xf32>
    %9 = vector.shape_cast %8 : vector<1x8x4xf32> to vector<8x4xf32>
    %cst_8 = arith.constant dense<0.000000e+00> : vector<8x256xf32>
    %10 = tpu.matmul %9, %7, %cst_8 {dimension_numbers = #tpu.dot_dimension_numbers<[1], [0], [0], [1], [0, 0, 1, 1], [], []>} : vector<8x4xf32>, vector<4x256xf32>, vector<8x256xf32> -> vector<8x256xf32>
    %11 = arith.addf %4, %10 : vector<8x256xf32>
    %12 = vector.extract_strided_slice %3 {offsets = [0, 1], sizes = [4, 256], strides = [1, 1]} : vector<4x290xf32> to vector<4x256xf32>
    %c1 = arith.constant 1 : index
    %c0_9 = arith.constant 0 : index
    %c0_10 = arith.constant 0 : index
    %13 = vector.load %arg1[%c1, %c0_9, %c0_10] : memref<9x8x4xf32, #tpu.memory_space<vmem>>, vector<1x8x4xf32>
    %14 = vector.shape_cast %13 : vector<1x8x4xf32> to vector<8x4xf32>
    %cst_11 = arith.constant dense<0.000000e+00> : vector<8x256xf32>
    %15 = tpu.matmul %14, %12, %cst_11 {dimension_numbers = #tpu.dot_dimension_numbers<[1], [0], [0], [1], [0, 0, 1, 1], [], []>} : vector<8x4xf32>, vector<4x256xf32>, vector<8x256xf32> -> vector<8x256xf32>
    %16 = arith.addf %11, %15 : vector<8x256xf32>
    %17 = vector.extract_strided_slice %3 {offsets = [0, 2], sizes = [4, 256], strides = [1, 1]} : vector<4x290xf32> to vector<4x256xf32>
    %18 = vector.broadcast %1 : vector<1x256xf32> to vector<4x256xf32>
    %19 = arith.mulf %17, %18 : vector<4x256xf32>
    %c2_12 = arith.constant 2 : index
    %c0_13 = arith.constant 0 : index
    %c0_14 = arith.constant 0 : index
    %20 = vector.load %arg1[%c2_12, %c0_13, %c0_14] : memref<9x8x4xf32, #tpu.memory_space<vmem>>, vector<1x8x4xf32>
    %21 = vector.shape_cast %20 : vector<1x8x4xf32> to vector<8x4xf32>
    %cst_15 = arith.constant dense<0.000000e+00> : vector<8x256xf32>
    %22 = tpu.matmul %21, %19, %cst_15 {dimension_numbers = #tpu.dot_dimension_numbers<[1], [0], [0], [1], [0, 0, 1, 1], [], []>} : vector<8x4xf32>, vector<4x256xf32>, vector<8x256xf32> -> vector<8x256xf32>
    %23 = arith.addf %16, %22 : vector<8x256xf32>
    %24 = vector.extract_strided_slice %3 {offsets = [0, 16], sizes = [4, 256], strides = [1, 1]} : vector<4x290xf32> to vector<4x256xf32>
    %25 = vector.broadcast %0 : vector<1x256xf32> to vector<4x256xf32>
    %26 = arith.mulf %24, %25 : vector<4x256xf32>
    %c3 = arith.constant 3 : index
    %c0_16 = arith.constant 0 : index
    %c0_17 = arith.constant 0 : index
    %27 = vector.load %arg1[%c3, %c0_16, %c0_17] : memref<9x8x4xf32, #tpu.memory_space<vmem>>, vector<1x8x4xf32>
    %28 = vector.shape_cast %27 : vector<1x8x4xf32> to vector<8x4xf32>
    %cst_18 = arith.constant dense<0.000000e+00> : vector<8x256xf32>
    %29 = tpu.matmul %28, %26, %cst_18 {dimension_numbers = #tpu.dot_dimension_numbers<[1], [0], [0], [1], [0, 0, 1, 1], [], []>} : vector<8x4xf32>, vector<4x256xf32>, vector<8x256xf32> -> vector<8x256xf32>
    %30 = arith.addf %23, %29 : vector<8x256xf32>
    %31 = vector.extract_strided_slice %3 {offsets = [0, 17], sizes = [4, 256], strides = [1, 1]} : vector<4x290xf32> to vector<4x256xf32>
    %c4 = arith.constant 4 : index
    %c0_19 = arith.constant 0 : index
    %c0_20 = arith.constant 0 : index
    %32 = vector.load %arg1[%c4, %c0_19, %c0_20] : memref<9x8x4xf32, #tpu.memory_space<vmem>>, vector<1x8x4xf32>
    %33 = vector.shape_cast %32 : vector<1x8x4xf32> to vector<8x4xf32>
    %cst_21 = arith.constant dense<0.000000e+00> : vector<8x256xf32>
    %34 = tpu.matmul %33, %31, %cst_21 {dimension_numbers = #tpu.dot_dimension_numbers<[1], [0], [0], [1], [0, 0, 1, 1], [], []>} : vector<8x4xf32>, vector<4x256xf32>, vector<8x256xf32> -> vector<8x256xf32>
    %35 = arith.addf %30, %34 : vector<8x256xf32>
    %36 = vector.extract_strided_slice %3 {offsets = [0, 18], sizes = [4, 256], strides = [1, 1]} : vector<4x290xf32> to vector<4x256xf32>
    %37 = vector.broadcast %1 : vector<1x256xf32> to vector<4x256xf32>
    %38 = arith.mulf %36, %37 : vector<4x256xf32>
    %c5 = arith.constant 5 : index
    %c0_22 = arith.constant 0 : index
    %c0_23 = arith.constant 0 : index
    %39 = vector.load %arg1[%c5, %c0_22, %c0_23] : memref<9x8x4xf32, #tpu.memory_space<vmem>>, vector<1x8x4xf32>
    %40 = vector.shape_cast %39 : vector<1x8x4xf32> to vector<8x4xf32>
    %cst_24 = arith.constant dense<0.000000e+00> : vector<8x256xf32>
    %41 = tpu.matmul %40, %38, %cst_24 {dimension_numbers = #tpu.dot_dimension_numbers<[1], [0], [0], [1], [0, 0, 1, 1], [], []>} : vector<8x4xf32>, vector<4x256xf32>, vector<8x256xf32> -> vector<8x256xf32>
    %42 = arith.addf %35, %41 : vector<8x256xf32>
    %43 = vector.extract_strided_slice %3 {offsets = [0, 32], sizes = [4, 256], strides = [1, 1]} : vector<4x290xf32> to vector<4x256xf32>
    %44 = vector.broadcast %0 : vector<1x256xf32> to vector<4x256xf32>
    %45 = arith.mulf %43, %44 : vector<4x256xf32>
    %c6 = arith.constant 6 : index
    %c0_25 = arith.constant 0 : index
    %c0_26 = arith.constant 0 : index
    %46 = vector.load %arg1[%c6, %c0_25, %c0_26] : memref<9x8x4xf32, #tpu.memory_space<vmem>>, vector<1x8x4xf32>
    %47 = vector.shape_cast %46 : vector<1x8x4xf32> to vector<8x4xf32>
    %cst_27 = arith.constant dense<0.000000e+00> : vector<8x256xf32>
    %48 = tpu.matmul %47, %45, %cst_27 {dimension_numbers = #tpu.dot_dimension_numbers<[1], [0], [0], [1], [0, 0, 1, 1], [], []>} : vector<8x4xf32>, vector<4x256xf32>, vector<8x256xf32> -> vector<8x256xf32>
    %49 = arith.addf %42, %48 : vector<8x256xf32>
    %50 = vector.extract_strided_slice %3 {offsets = [0, 33], sizes = [4, 256], strides = [1, 1]} : vector<4x290xf32> to vector<4x256xf32>
    %c7 = arith.constant 7 : index
    %c0_28 = arith.constant 0 : index
    %c0_29 = arith.constant 0 : index
    %51 = vector.load %arg1[%c7, %c0_28, %c0_29] : memref<9x8x4xf32, #tpu.memory_space<vmem>>, vector<1x8x4xf32>
    %52 = vector.shape_cast %51 : vector<1x8x4xf32> to vector<8x4xf32>
    %cst_30 = arith.constant dense<0.000000e+00> : vector<8x256xf32>
    %53 = tpu.matmul %52, %50, %cst_30 {dimension_numbers = #tpu.dot_dimension_numbers<[1], [0], [0], [1], [0, 0, 1, 1], [], []>} : vector<8x4xf32>, vector<4x256xf32>, vector<8x256xf32> -> vector<8x256xf32>
    %54 = arith.addf %49, %53 : vector<8x256xf32>
    %55 = vector.extract_strided_slice %3 {offsets = [0, 34], sizes = [4, 256], strides = [1, 1]} : vector<4x290xf32> to vector<4x256xf32>
    %56 = vector.broadcast %1 : vector<1x256xf32> to vector<4x256xf32>
    %57 = arith.mulf %55, %56 : vector<4x256xf32>
    %c8 = arith.constant 8 : index
    %c0_31 = arith.constant 0 : index
    %c0_32 = arith.constant 0 : index
    %58 = vector.load %arg1[%c8, %c0_31, %c0_32] : memref<9x8x4xf32, #tpu.memory_space<vmem>>, vector<1x8x4xf32>
    %59 = vector.shape_cast %58 : vector<1x8x4xf32> to vector<8x4xf32>
    %cst_33 = arith.constant dense<0.000000e+00> : vector<8x256xf32>
    %60 = tpu.matmul %59, %57, %cst_33 {dimension_numbers = #tpu.dot_dimension_numbers<[1], [0], [0], [1], [0, 0, 1, 1], [], []>} : vector<8x4xf32>, vector<4x256xf32>, vector<8x256xf32> -> vector<8x256xf32>
    %61 = arith.addf %54, %60 : vector<8x256xf32>
    %cst_34 = arith.constant dense<0.000000e+00> : vector<8xf32>
    %62 = vector.multi_reduction <add>, %61, %cst_34 [1] : vector<8x256xf32> to vector<8xf32>
    %63 = vector.shape_cast %62 : vector<8xf32> to vector<8x1xf32>
    %64 = arith.mulf %61, %61 : vector<8x256xf32>
    %cst_35 = arith.constant dense<0.000000e+00> : vector<8xf32>
    %65 = vector.multi_reduction <add>, %64, %cst_35 [1] : vector<8x256xf32> to vector<8xf32>
    %66 = vector.shape_cast %65 : vector<8xf32> to vector<8x1xf32>
    %cst_36 = arith.constant 3.906250e-03 : f32
    %67 = vector.broadcast %cst_36 : f32 to vector<8x1xf32>
    %68 = arith.mulf %63, %67 : vector<8x1xf32>
    %cst_37 = arith.constant 3.906250e-03 : f32
    %69 = vector.broadcast %cst_37 : f32 to vector<8x1xf32>
    %70 = arith.mulf %66, %69 : vector<8x1xf32>
    %71 = arith.mulf %68, %68 : vector<8x1xf32>
    %72 = arith.subf %70, %71 : vector<8x1xf32>
    %cst_38 = arith.constant 0.000000e+00 : f32
    %73 = vector.broadcast %cst_38 : f32 to vector<8x1xf32>
    %74 = arith.maximumf %72, %73 : vector<8x1xf32>
    %75 = vector.broadcast %68 : vector<8x1xf32> to vector<8x256xf32>
    %76 = arith.subf %61, %75 : vector<8x256xf32>
    %cst_39 = arith.constant 9.99999974E-6 : f32
    %77 = vector.broadcast %cst_39 : f32 to vector<8x1xf32>
    %78 = arith.addf %74, %77 : vector<8x1xf32>
    %79 = math.rsqrt %78 : vector<8x1xf32>
    %80 = vector.broadcast %79 : vector<8x1xf32> to vector<8x256xf32>
    %81 = arith.mulf %76, %80 : vector<8x256xf32>
    %cst_40 = arith.constant 0.000000e+00 : f32
    %82 = vector.broadcast %cst_40 : f32 to vector<8x256xf32>
    %83 = arith.subf %82, %81 : vector<8x256xf32>
    %84 = math.exp %83 : vector<8x256xf32>
    %cst_41 = arith.constant 1.000000e+00 : f32
    %85 = vector.broadcast %cst_41 : f32 to vector<8x256xf32>
    %86 = arith.addf %85, %84 : vector<8x256xf32>
    %cst_42 = arith.constant 1.000000e+00 : f32
    %87 = vector.broadcast %cst_42 : f32 to vector<8x256xf32>
    %88 = arith.divf %87, %86 : vector<8x256xf32>
    %cst_43 = arith.constant 2.000000e+00 : f32
    %89 = vector.broadcast %cst_43 : f32 to vector<8x256xf32>
    %90 = arith.addf %88, %89 : vector<8x256xf32>
    %91 = arith.mulf %88, %90 : vector<8x256xf32>
    %92 = arith.mulf %81, %91 : vector<8x256xf32>
    %cst_44 = arith.constant 2.000000e+00 : f32
    %93 = vector.broadcast %cst_44 : f32 to vector<8x256xf32>
    %94 = arith.addf %91, %93 : vector<8x256xf32>
    %95 = arith.divf %92, %94 : vector<8x256xf32>
    %c0_45 = arith.constant 0 : index
    %c0_46 = arith.constant 0 : index
    %c0_47 = arith.constant 0 : index
    %96 = vector.load %arg4[%c0_45, %c0_46, %c0_47] : memref<1x8x256xf32, #tpu.memory_space<vmem>>, vector<1x8x256xf32>
    %97 = vector.shape_cast %96 : vector<1x8x256xf32> to vector<8x256xf32>
    %98 = vector.shape_cast %95 : vector<8x256xf32> to vector<1x8x256xf32>
    tpu.vector_store %arg4[%c0_45, %c0_46, %c0_47], %98 {strides = array<i32>} : memref<1x8x256xf32, #tpu.memory_space<vmem>>, vector<1x8x256xf32>,
    return
  }
  func.func @transform_0(%arg0: i32) -> (i32, i32, i32) {
    %c0_i32 = arith.constant 0 : i32
    %c0_i32_0 = arith.constant 0 : i32
    %c0_i32_1 = arith.constant 0 : i32
    %c0_i32_2 = arith.constant 0 : i32
    return %c0_i32, %c0_i32_0, %c0_i32_1 : i32, i32, i32
  }
  func.func @transform_1(%arg0: i32) -> (i32, i32) {
    %c0_i32 = arith.constant 0 : i32
    %c0_i32_0 = arith.constant 0 : i32
    %c0_i32_1 = arith.constant 0 : i32
    return %c0_i32, %c0_i32_0 : i32, i32
  }
  func.func @transform_2(%arg0: i32) -> (i32, i32, i32) {
    %c0_i32 = arith.constant 0 : i32
    %c0_i32_0 = arith.constant 0 : i32
    %c0_i32_1 = arith.constant 0 : i32
    return %arg0, %c0_i32, %c0_i32_0 : i32, i32, i32
  }
  func.func @transform_3(%arg0: i32) -> (i32, i32, i32) {
    %c0_i32 = arith.constant 0 : i32
    %c0_i32_0 = arith.constant 0 : i32
    %c0_i32_1 = arith.constant 0 : i32
    return %arg0, %c0_i32, %c0_i32_0 : i32, i32, i32
  }
}

</mosaic_0001>

<bundles_post_ra>
// kernel: tpu_custom_call.1
= control target key start
LH: loop header
LB: loop body
LE: loop exit
PB: predicated region body
PF: predicated region fallthrough
CT: control target
= control target key end

     0   :  { %8 = vsyncpa [#allocation3], 0  ;;  %s1415_s0 = inlined_call_operand.vmem [shape: f32[9,8,4], index: 0, kind: input, shape index: {}]   ;;  %s1416_s1 = inlined_call_operand.vmem [shape: f32[3,256], index: 1, kind: input, shape index: {}]   ;;  %s1417_s2 = inlined_call_operand.vmem [shape: f32[2,4,290], index: 2, kind: input, shape index: {}]   ;;  %s1418_s3 = inlined_call_operand.hbm [shape: f32[2,8,256], index: 3, kind: output, shape index: {}]  }
   0x1   :  { %10 = vsyncpa [#allocation3 + $0x1], 0  ;;  %s1226_s12 = smov 0   ;;  %s1228_s13 = smov 0  }
   0x2   :  { %s1230_s14 = smov 0   ;;  %s1232_s15 = smov 0  }
   0x3 LB: > { %s1247_s16 = sadd.s32 4294967295, %s1191_s15   ;;  %s1005_s17 = sadd.s32 4294967294, %s1191_s15   ;;  %s1191_s15 = sphi %s1232_s15, %s1424_s15   ;;  %s1187_s14 = sphi %s1230_s14, %s1423_s14   ;;  %s1183_s13 = sphi %s1228_s13, %s1422_s13   ;;  %s1179_s12 = sphi %s1226_s12, %s1421_s12  }
   0x4   : > { %s1251_s18 = sadd.s32 1, %s1191_s15   ;;  %s91_s19 = sadd.s32 1, %s1187_s14 }
   0x5   : > { %s88_s20 = ssub.s32 %s1191_s15, %s1251_s18  ;;  %p101_p0 = scmp.ne.s32.totalorder %s1187_s14, %s1183_s13 }
   0x6   : > { %p89_p1 = scmp.eq.s32.totalorder %s88_s20, 0  ;;  %p102_p2 = scmp.eq.s32.totalorder %s1247_s16, 1 }
   0x7   : > { %p107_p3 = scmp.ne.s32.totalorder %s1183_s13, %s1179_s12  ;;  %p108_p4 = scmp.eq.s32.totalorder %s1005_s17, 1 }
   0x8   : > { %s1262_s21 = scalar_select %p89_p1, %s1187_s14, %s91_s19  }
   0x9   : > { %p1264_p5 = por %p102_p2, %p101_p0  ;;  %p1268_p6 = por %p108_p4, %p107_p3 }
   0xa   : > { %p1008_p7 = scmp.ge.s32.totalorder %s1191_s15, 1  ;;  %p140_p8 = scmp.lt.s32.totalorder %s1191_s15, 3 }
   0xc   : > { %p141_p9 = pnand %p1008_p7, %p140_p8 }
   0xd   : > { %p164_p10 = scmp.lt.s32.totalorder (!%p141_p9), %s1247_s16, 1  ;;  %s1193_s30 = smov (!%p141_p9), 2  }
   0xe   : > { %144 = sbr.rel (%p141_p9) target bundleno = 654 (0x28e), region = 32  ;;  %s1194_s4 = smov (!%p141_p9), 18  }
   0xf   : > { %s1195_s8 = smov (!%p141_p9), 34   ;;  %s1196_s9 = smov (!%p141_p9), 16  }
  0x10   : > { %s1197_s10 = smov (!%p141_p9), 32   ;;  %s1198_s11 = smov (!%p141_p9), 127  }
  0x11   : > { %s1199_s17 = smov (!%p141_p9), 126   ;;  %s1200_s19 = smov (!%p141_p9), 112  }
  0x12   : > { %s1201_s20 = smov (!%p141_p9), 111   ;;  %s1202_s24 = smov (!%p141_p9), 110  }
  0x13   : > { %v1011_v0 = vld [vmem:[%s1416_s1 + $0x2] ss:$4 sm:$0x3]  ;;  %v169_v3 = vld [vmem:[%s1416_s1] ss:$4 sm:$0x3] }
  0x14   : > { %v302_v1 = vperm.slane %v1011_v0, 0  ;;  %v303_v2 = vperm.slane %v1011_v0, 1  ;;  %vm178_vm0 = vcmask 1043456   ;;  %v176_v5 = vperm.slane %v169_v3, 1  ;;  %s165_s28 = scalar_select %p164_p10, %s1247_s16, 1 }
  0x15   : > { %v175_v7 = vperm.slane %v169_v3, 0  ;;  %vm309_vm1 = vcmask 15360   ;;  %vm386_vm2 = vcmask 130048   ;;  %vm529_vm3 = vcmask 146432   ;;  %s1203_s25 = smov 96   ;;  %s1204_s26 = smov 95  }
  0x16   : > { %v304_v4 = vrot.slane %v303_v2, 4  ;;  %s1062_s29 = smul.u32 12, %s165_s28  ;;  %v177_v8 = vrot.slane %v176_v5, 4  ;;  %vm606_vm4 = vcmask 261120   ;;  %vm749_vm5 = vcmask 277504   ;;  %s1205_s27 = smov 94  }
  0x17   : > { %vm199_vm6 = vcmask 1039360   ;;  %v1012_v5 = vld [vmem:[%s1415_s0 + $0x8] sm:$0xff]  ;;  %vm202_vm7 = vcmask 31744   ;;  %vm331_vm8 = vcmask 1031168   ;;  %vm408_vm9 = vcmask 916480   ;;  %s161_s28 = sand.u32 1, %s1183_s13  }
  0x18   : > { %v305_v6 = vsel %vm178_vm0, %v302_v1, %v304_v4  ;;  %s168_s7 = scalar_lea.vmem %s1417_s2, %s1062_s29  ;;  %v179_v10 = vsel %vm178_vm0, %v175_v7, %v177_v8  ;;  %vm474_vm10 = vcmask 908288   ;;  %vm551_vm11 = vcmask 900096   ;;  %s1009_s29 = sshll.u32 %s161_s28, 4 }
  0x19   : > { %306 = vrot.lane.b32.xlu0 %v305_v6, %s1193_s30  ;;  %526 = vrot.lane.b32.xlu1 %v305_v6, %s1194_s4  ;;  %v1286_v9 = vld [vmem:[%s168_s7] sm:$0xff]  ;;  %v1291_v14 = vld [vmem:[%s168_s7 + $0x8] sm:$0xf]  ;;  %vm628_vm12 = vcmask 785408   ;;  %vm694_vm13 = vcmask 777216   ;;  %vm771_vm14 = vcmask 769024  }
  0x1a   : > { %746 = vrot.lane.b32.xlu2 %v305_v6, %s1195_s8  ;;  %187 = vst [vmem:[#allocation1] ss:$2 sm:$0xff] %v1286_v9  ;;  %v181_v11 = vmul.f32 %v179_v10, %v1286_v9  ;;  %v182_v6 = vld [vmem:[%s1415_s0] sm:$0xff]  ;;  %s1061_s30 = sshll.u32 %s1247_s16, 4  ;;  %s163_s16 = scalar_lea.vmem [#allocation2], %s1009_s29 }
  0x1b   : > { %189 = vst [vmem:[#allocation1 + $0x10] ss:$2 sm:$0xff] %v1291_v14  ;;  %s941_s6 = scalar_lea.hbm %s1418_s3, %s1061_s30  ;;  %s943_s7 = sshll.u32 %s163_s16, 4  ;;  %s944_s7 = int_to_ptr.vmem [resolvable:$true] %s943_s7 }
  0x1c   : > { %s945_s8 = sshll.u32 %s941_s6, 4  ;;  %s946_s8 = int_to_ptr.hbm [resolvable:$true] %s945_s8 }
  0x21   : > { %383 = vrot.lane.b32.xlu0 %v179_v10, %s1196_s9  ;;  %603 = vrot.lane.b32.xlu1 %v179_v10, %s1197_s10  ;;  %v190_v12 = vld.sshfl [vmem:[#allocation1] sm:$0xff pattern:$0x75316420]  ;;  %v191_v13 = vld.sshfl [vmem:[#allocation1 + $0x8] sm:$0xff pattern:$0x75316420] }
  0x22   : > { %251 = vst [vmem:[#allocation1] ss:$2 sm:$0xff] %v181_v11  ;;  %193 = vrot.lane.b32.xlu2 %v190_v12, %s1198_s11  ;;  %v192_v17 = vld.sshfl [vmem:[#allocation1 + $0x10] sm:$0xff pattern:$0x75316420]  ;;  %s930_s9 = scalar_lea.sflag [#allocation3], %s161_s28 }
  0x23   : > { %v1021_v11 = vld [vmem:[%s1415_s0 + $0x10] sm:$0xff]  ;;  %s1143_s10 = sshra.s32 %s946_s8, 4  ;;  %s1144_s10 = int_to_ptr.hbm [resolvable:$true] %s1143_s10 }
  0x24   : > { %p1150_p0 = scmp.lt.s32.totalorder %s1144_s10, %s1418_s3 }
  0x29   : > { %195 = vrot.lane.b32.xlu0 %v191_v13, %s1198_s11  ;;  %v252_v15 = vld.sshfl [vmem:[#allocation1] sm:$0xff pattern:$0x75316420]  ;;  %v253_v16 = vld.sshfl [vmem:[#allocation1 + $0x8] sm:$0xff pattern:$0x75316420]  ;;  %197 = vrot.lane.b32.xlu1 %v192_v17, %s1198_s11 }
  0x2a   : > { %1017 = vmatpush.msk.msra.mxu2 %vm178_vm0, %v252_v15  ;;  %1019 = vmatpush.msk.msra.mxu3 %vm178_vm0, %v253_v16  ;;  %v1026_v17 = vld [vmem:[%s1415_s0 + $0x18] sm:$0xff]  ;;  %s1145_s11 = scalar_lea.hbm %s1144_s10, 16 }
  0x2b   : > { %1018 = vmatmul.msk.f32.vlgmr.msra.gmra.mxu2 %vm202_vm7, %v182_v6  ;;  %1020 = vmatmul.msk.f32.vlgmr.msra.gmra.mxu3 %vm202_vm7, %v182_v6  ;;  %p1146_p11 = scmp.ne.s32.totalorder %s1144_s10, %s1145_s11 }
  0x2d   : > { %p1147_p12 = pnand %p1146_p11, %p1264_p5 }
  0x2f   : > { %p1148_p13 = pneg %p1147_p12 }
  0x74   : > { %v747_v50 = vpop.permute.xlu2 %746 }
  0x75   : > { %v748_v52 = vrot.slane %v747_v50, 4 }
  0x77   : > { %v754_v55 = vmul.f32 %v748_v52, %v1291_v14  ;;  %v750_v56 = vsel %vm749_vm5, %v748_v52, %v747_v50 }
  0x78   : > { %v753_v58 = vmul.f32 %v750_v56, %v1286_v9 }
  0x7c   : > { %v194_v2 = vpop.permute.xlu2 %193 }
  0x8b   : > { %v307_v18 = vpop.permute.xlu0 %306  ;;  %v527_v31 = vpop.permute.xlu1 %526 }
  0x8c   : > { %v308_v19 = vrot.slane %v307_v18, 4  ;;  %v528_v33 = vrot.slane %v527_v31, 4 }
  0x8e   : > { %v310_v20 = vsel %vm309_vm1, %v308_v19, %v307_v18  ;;  %v314_v21 = vmul.f32 %v308_v19, %v1291_v14  ;;  %v534_v36 = vmul.f32 %v528_v33, %v1291_v14  ;;  %v530_v37 = vsel %vm529_vm3, %v528_v33, %v527_v31 }
  0x8f   : > { %v313_v22 = vmul.f32 %v310_v20, %v1286_v9  ;;  %v533_v40 = vmul.f32 %v530_v37, %v1286_v9 }
  0x90   : > { %321 = vst [vmem:[#allocation1 + $0x10] ss:$2 sm:$0xff] %v314_v21 }
  0x91   : > { %319 = vst [vmem:[#allocation1] ss:$2 sm:$0xff] %v313_v22  ;;  %v1031_v22 = vld [vmem:[%s1415_s0 + $0x20] sm:$0xff] }
  0x93   : > { %v384_v23 = vpop.permute.xlu0 %383  ;;  %v604_v38 = vpop.permute.xlu1 %603 }
  0x94   : > { %v385_v24 = vrot.slane %v384_v23, 4  ;;  %v605_v41 = vrot.slane %v604_v38, 4 }
  0x96   : > { %v387_v25 = vsel %vm386_vm2, %v385_v24, %v384_v23  ;;  %v391_v26 = vmul.f32 %v385_v24, %v1291_v14  ;;  %v611_v44 = vmul.f32 %v605_v41, %v1291_v14  ;;  %v607_v45 = vsel %vm606_vm4, %v605_v41, %v604_v38 }
  0x97   : > { %v324_v27 = vld.sshfl [vmem:[#allocation1 + $0x10] sm:$0xff pattern:$0x75316420]  ;;  %v390_v28 = vmul.f32 %v387_v25, %v1286_v9  ;;  %v610_v47 = vmul.f32 %v607_v45, %v1286_v9 }
  0x98   : > { %398 = vst [vmem:[#allocation1 + $0x10] ss:$2 sm:$0xff] %v391_v26  ;;  %329 = vrot.lane.b32.xlu1 %v324_v27, %s1199_s17  ;;  %v323_v29 = vld.sshfl [vmem:[#allocation1 + $0x8] sm:$0xff pattern:$0x75316420] }
  0x99   : > { %327 = vrot.lane.b32.xlu0 %v323_v29, %s1199_s17  ;;  %v322_v30 = vld.sshfl [vmem:[#allocation1] sm:$0xff pattern:$0x75316420] }
  0x9a   : > { %325 = vrot.lane.b32.xlu2 %v322_v30, %s1199_s17  ;;  %396 = vst [vmem:[#allocation1] ss:$2 sm:$0xff] %v390_v28  ;;  %v1036_v28 = vld [vmem:[%s1415_s0 + $0x28] sm:$0xff] }
  0x9b   : > { %v198_v0 = vpop.permute.xlu1 %197  ;;  %v196_v1 = vpop.permute.xlu0 %195 }
  0x9c   : > { %v200_v3 = vsel %vm199_vm6, %v194_v2, %v196_v1  ;;  %v201_v4 = vsel %vm199_vm6, %v196_v1, %v198_v0 }
  0x9d   : > { %1013 = vmatpush.msk.msra.mxu0 %vm178_vm0, %v200_v3  ;;  %1015 = vmatpush.msk.msra.mxu1 %vm178_vm0, %v201_v4 }
  0x9e   : > { %1014 = vmatmul.msk.f32.vlgmr.msra.gmra.mxu0 %vm202_vm7, %v1012_v5  ;;  %1016 = vmatmul.msk.f32.vlgmr.msra.gmra.mxu1 %vm202_vm7, %v1012_v5 }
  0x9f   : > { %v401_v32 = vld.sshfl [vmem:[#allocation1 + $0x10] sm:$0xff pattern:$0x75316420] }
  0xa0   : > { %406 = vrot.lane.b32.xlu1 %v401_v32, %s1200_s19  ;;  %464 = vst [vmem:[#allocation1 + $0x10] ss:$2 sm:$0xff] %v1291_v14 }
  0xa1   : > { %v400_v34 = vld.sshfl [vmem:[#allocation1 + $0x8] sm:$0xff pattern:$0x75316420]  ;;  %v399_v35 = vld.sshfl [vmem:[#allocation1] sm:$0xff pattern:$0x75316420] }
  0xa2   : > { %404 = vrot.lane.b32.xlu0 %v400_v34, %s1200_s19  ;;  %402 = vrot.lane.b32.xlu2 %v399_v35, %s1200_s19  ;;  %462 = vst [vmem:[#allocation1] ss:$2 sm:$0xff] %v1286_v9  ;;  %v1041_v34 = vld [vmem:[%s1415_s0 + $0x30] sm:$0xff] }
  0xa7   : > { %v467_v39 = vld.sshfl [vmem:[#allocation1 + $0x10] sm:$0xff pattern:$0x75316420] }
  0xa8   : > { %472 = vrot.lane.b32.xlu1 %v467_v39, %s1201_s20  ;;  %541 = vst [vmem:[#allocation1 + $0x10] ss:$2 sm:$0xff] %v534_v36 }
  0xa9   : > { %v466_v42 = vld.sshfl [vmem:[#allocation1 + $0x8] sm:$0xff pattern:$0x75316420]  ;;  %v465_v43 = vld.sshfl [vmem:[#allocation1] sm:$0xff pattern:$0x75316420] }
  0xaa   : > { %470 = vrot.lane.b32.xlu0 %v466_v42, %s1201_s20  ;;  %468 = vrot.lane.b32.xlu2 %v465_v43, %s1201_s20  ;;  %539 = vst [vmem:[#allocation1] ss:$2 sm:$0xff] %v533_v40  ;;  %v1046_v40 = vld [vmem:[%s1415_s0 + $0x38] sm:$0xff]  ;;  %s1149_s20 = scalar_lea.hbm %s1418_s3, 32 }
  0xab   : > { %p1151_p1 = scmp.lt.s32.totalorder %s1149_s20, %s1145_s11 }
  0xad   : > { %p1152_p2 = por %p1151_p1, %p1150_p0 }
  0xae   : > { %v298_v52 = vpop.f32.mrf.mxu3 }
  0xaf   : > { %v544_v46 = vld.sshfl [vmem:[#allocation1 + $0x10] sm:$0xff pattern:$0x75316420]  ;;  %p1153_p3 = pnand %p1152_p2, %p1148_p13 }
  0xb0   : > { %549 = vrot.lane.b32.xlu1 %v544_v46, %s1202_s24  ;;  %618 = vst [vmem:[#allocation1 + $0x10] ss:$2 sm:$0xff] %v611_v44  ;;  %v1051_v46 = vld [vmem:[%s1415_s0 + $0x40] sm:$0xff] }
  0xb1   : > { %v543_v48 = vld.sshfl [vmem:[#allocation1 + $0x8] sm:$0xff pattern:$0x75316420]  ;;  %v542_v49 = vld.sshfl [vmem:[#allocation1] sm:$0xff pattern:$0x75316420] }
  0xb2   : > { %547 = vrot.lane.b32.xlu0 %v543_v48, %s1202_s24  ;;  %545 = vrot.lane.b32.xlu2 %v542_v49, %s1202_s24  ;;  %616 = vst [vmem:[#allocation1] ss:$2 sm:$0xff] %v610_v47 }
  0xb7   : > { %v621_v51 = vld.sshfl [vmem:[#allocation1 + $0x10] sm:$0xff pattern:$0x75316420] }
  0xb8   : > { %626 = vrot.lane.b32.xlu1 %v621_v51, %s1203_s25  ;;  %684 = vst [vmem:[#allocation1 + $0x10] ss:$2 sm:$0xff] %v1291_v14  ;;  %v278_v51 = vpop.f32.mrf.mxu2 }
  0xb9   : > { %v620_v53 = vld.sshfl [vmem:[#allocation1 + $0x8] sm:$0xff pattern:$0x75316420]  ;;  %v619_v54 = vld.sshfl [vmem:[#allocation1] sm:$0xff pattern:$0x75316420] }
  0xba   : > { %624 = vrot.lane.b32.xlu0 %v620_v53, %s1203_s25  ;;  %622 = vrot.lane.b32.xlu2 %v619_v54, %s1203_s25  ;;  %682 = vst [vmem:[#allocation1] ss:$2 sm:$0xff] %v1286_v9 }
  0xbf   : > { %v687_v57 = vld.sshfl [vmem:[#allocation1 + $0x10] sm:$0xff pattern:$0x75316420] }
  0xc0   : > { %692 = vrot.lane.b32.xlu1 %v687_v57, %s1204_s26  ;;  %761 = vst [vmem:[#allocation1 + $0x10] ss:$2 sm:$0xff] %v754_v55 }
  0xc1   : > { %v686_v59 = vld.sshfl [vmem:[#allocation1 + $0x8] sm:$0xff pattern:$0x75316420]  ;;  %v685_v60 = vld.sshfl [vmem:[#allocation1] sm:$0xff pattern:$0x75316420] }
  0xc2   : > { %690 = vrot.lane.b32.xlu0 %v686_v59, %s1204_s26  ;;  %688 = vrot.lane.b32.xlu2 %v685_v60, %s1204_s26  ;;  %759 = vst [vmem:[#allocation1] ss:$2 sm:$0xff] %v753_v58 }
  0xc7   : > { %v764_v61 = vld.sshfl [vmem:[#allocation1 + $0x10] sm:$0xff pattern:$0x75316420] }
  0xc8   : > { %769 = vrot.lane.b32.xlu1 %v764_v61, %s1205_s27 }
  0xc9   : > { %v763_v62 = vld.sshfl [vmem:[#allocation1 + $0x8] sm:$0xff pattern:$0x75316420]  ;;  %v762_v63 = vld.sshfl [vmem:[#allocation1] sm:$0xff pattern:$0x75316420] }
  0xca   : > { %767 = vrot.lane.b32.xlu0 %v763_v62, %s1205_s27  ;;  %765 = vrot.lane.b32.xlu2 %v762_v63, %s1205_s27 }
  0xf4   : > { %v326_v7 = vpop.permute.xlu2 %325 }
  0xfc   : > { %v403_v8 = vpop.permute.xlu2 %402 }
 0x104   : > { %v469_v15 = vpop.permute.xlu2 %468 }
 0x10a   : > { %v330_v9 = vpop.permute.xlu1 %329 }
 0x10b   : > { %v328_v10 = vpop.permute.xlu0 %327 }
 0x10c   : > { %v332_v12 = vsel %vm331_vm8, %v326_v7, %v328_v10  ;;  %v333_v13 = vsel %vm331_vm8, %v328_v10, %v330_v9  ;;  %v546_v25 = vpop.permute.xlu2 %545 }
 0x10d   : > { %1022 = vmatpush.msk.msrb.mxu0 %vm178_vm0, %v332_v12  ;;  %1024 = vmatpush.msk.msrb.mxu1 %vm178_vm0, %v333_v13 }
 0x10e   : > { %1023 = vmatmul.msk.f32.vlgmr.msrb.gmra.mxu0 %vm202_vm7, %v1021_v11  ;;  %1025 = vmatmul.msk.f32.vlgmr.msrb.gmra.mxu1 %vm202_vm7, %v1021_v11 }
 0x112   : > { %v407_v14 = vpop.permute.xlu1 %406 }
 0x114   : > { %v405_v16 = vpop.permute.xlu0 %404  ;;  %v623_v31 = vpop.permute.xlu2 %622 }
 0x115   : > { %v409_v18 = vsel %vm408_vm9, %v403_v8, %v405_v16  ;;  %v410_v19 = vsel %vm408_vm9, %v405_v16, %v407_v14 }
 0x116   : > { %1027 = vmatpush.msk.msrb.mxu2 %vm178_vm0, %v409_v18  ;;  %1029 = vmatpush.msk.msrb.mxu3 %vm178_vm0, %v410_v19 }
 0x117   : > { %1028 = vmatmul.msk.f32.vlgmr.msrb.gmra.mxu2 %vm202_vm7, %v1026_v17  ;;  %1030 = vmatmul.msk.f32.vlgmr.msrb.gmra.mxu3 %vm202_vm7, %v1026_v17 }
 0x11a   : > { %v473_v20 = vpop.permute.xlu1 %472 }
 0x11b   : > { %v227_v49 = vpop.f32.mrf.mxu0  ;;  %v247_v50 = vpop.f32.mrf.mxu1 }
 0x11c   : > { %v471_v21 = vpop.permute.xlu0 %470  ;;  %v689_v37 = vpop.permute.xlu2 %688  ;;  %v279_v55 = vadd.f32 %v278_v51, %v227_v49  ;;  %v299_v56 = vadd.f32 %v298_v52, %v247_v50 }
 0x11d   : > { %v475_v23 = vsel %vm474_vm10, %v469_v15, %v471_v21  ;;  %v476_v24 = vsel %vm474_vm10, %v471_v21, %v473_v20 }
 0x11e   : > { %1032 = vmatpush.msk.msra.mxu0 %vm178_vm0, %v475_v23  ;;  %1034 = vmatpush.msk.msra.mxu1 %vm178_vm0, %v476_v24 }
 0x11f   : > { %1033 = vmatmul.msk.f32.vlgmr.msra.gmra.mxu0 %vm202_vm7, %v1031_v22  ;;  %1035 = vmatmul.msk.f32.vlgmr.msra.gmra.mxu1 %vm202_vm7, %v1031_v22 }
 0x122   : > { %v550_v26 = vpop.permute.xlu1 %549 }
 0x124   : > { %v548_v27 = vpop.permute.xlu0 %547  ;;  %v766_v44 = vpop.permute.xlu2 %765 }
 0x125   : > { %v552_v29 = vsel %vm551_vm11, %v546_v25, %v548_v27  ;;  %v553_v30 = vsel %vm551_vm11, %v548_v27, %v550_v26 }
 0x126   : > { %1037 = vmatpush.msk.msra.mxu2 %vm178_vm0, %v552_v29  ;;  %1039 = vmatpush.msk.msra.mxu3 %vm178_vm0, %v553_v30 }
 0x127   : > { %1038 = vmatmul.msk.f32.vlgmr.msra.gmra.mxu2 %vm202_vm7, %v1036_v28  ;;  %1040 = vmatmul.msk.f32.vlgmr.msra.gmra.mxu3 %vm202_vm7, %v1036_v28 }
 0x12a   : > { %v627_v32 = vpop.permute.xlu1 %626 }
 0x12c   : > { %v625_v33 = vpop.permute.xlu0 %624 }
 0x12d   : > { %v629_v35 = vsel %vm628_vm12, %v623_v31, %v625_v33  ;;  %v630_v36 = vsel %vm628_vm12, %v625_v33, %v627_v32 }
 0x12e   : > { %1042 = vmatpush.msk.msrb.mxu0 %vm178_vm0, %v629_v35  ;;  %1044 = vmatpush.msk.msrb.mxu1 %vm178_vm0, %v630_v36 }
 0x12f   : > { %1043 = vmatmul.msk.f32.vlgmr.msrb.gmra.mxu0 %vm202_vm7, %v1041_v34  ;;  %1045 = vmatmul.msk.f32.vlgmr.msrb.gmra.mxu1 %vm202_vm7, %v1041_v34 }
 0x132   : > { %v693_v38 = vpop.permute.xlu1 %692 }
 0x134   : > { %v691_v39 = vpop.permute.xlu0 %690 }
 0x135   : > { %v695_v41 = vsel %vm694_vm13, %v689_v37, %v691_v39  ;;  %v696_v42 = vsel %vm694_vm13, %v691_v39, %v693_v38 }
 0x136   : > { %1047 = vmatpush.msk.msrb.mxu2 %vm178_vm0, %v695_v41  ;;  %1049 = vmatpush.msk.msrb.mxu3 %vm178_vm0, %v696_v42 }
 0x137   : > { %1048 = vmatmul.msk.f32.vlgmr.msrb.gmra.mxu2 %vm202_vm7, %v1046_v40  ;;  %1050 = vmatmul.msk.f32.vlgmr.msrb.gmra.mxu3 %vm202_vm7, %v1046_v40 }
 0x13a   : > { %v770_v43 = vpop.permute.xlu1 %769 }
 0x13c   : > { %v768_v45 = vpop.permute.xlu0 %767 }
 0x13d   : > { %v772_v47 = vsel %vm771_vm14, %v766_v44, %v768_v45  ;;  %v773_v48 = vsel %vm771_vm14, %v768_v45, %v770_v43 }
 0x13e   : > { %1052 = vmatpush.msk.msra.mxu0 %vm178_vm0, %v772_v47  ;;  %1054 = vmatpush.msk.msra.mxu1 %vm178_vm0, %v773_v48 }
 0x13f   : > { %1053 = vmatmul.msk.f32.vlgmr.msra.gmra.mxu0 %vm202_vm7, %v1051_v46  ;;  %1055 = vmatmul.msk.f32.vlgmr.msra.gmra.mxu1 %vm202_vm7, %v1051_v46 }
 0x18b   : > { %v358_v53 = vpop.f32.mrf.mxu0  ;;  %v378_v54 = vpop.f32.mrf.mxu1 }
 0x18c   : > { %v381_v59 = vadd.f32 %v358_v53, %v279_v55  ;;  %v382_v60 = vadd.f32 %v378_v54, %v299_v56 }
 0x19a   : > { %v435_v57 = vpop.f32.mrf.mxu2  ;;  %v455_v58 = vpop.f32.mrf.mxu3 }
 0x19b   : > { %v458_v63 = vadd.f32 %v435_v57, %v381_v59  ;;  %v459_v0 = vadd.f32 %v455_v58, %v382_v60 }
 0x19c   : > { %v501_v61 = vpop.f32.mrf.mxu0  ;;  %v521_v62 = vpop.f32.mrf.mxu1 }
 0x19d   : > { %v524_v3 = vadd.f32 %v501_v61, %v458_v63  ;;  %v525_v4 = vadd.f32 %v521_v62, %v459_v0 }
 0x1aa   : > { %v578_v1 = vpop.f32.mrf.mxu2  ;;  %v598_v2 = vpop.f32.mrf.mxu3 }
 0x1ab   : > { %v601_v7 = vadd.f32 %v578_v1, %v524_v3  ;;  %v602_v8 = vadd.f32 %v598_v2, %v525_v4 }
 0x1ac   : > { %v655_v5 = vpop.f32.mrf.mxu0  ;;  %v675_v6 = vpop.f32.mrf.mxu1 }
 0x1ad   : > { %v678_v9 = vadd.f32 %v655_v5, %v601_v7  ;;  %v679_v10 = vadd.f32 %v675_v6, %v602_v8 }
 0x1ba   : > { %v721_v11 = vpop.f32.mrf.mxu2  ;;  %v741_v12 = vpop.f32.mrf.mxu3 }
 0x1bb   : > { %v744_v13 = vadd.f32 %v721_v11, %v678_v9  ;;  %v745_v14 = vadd.f32 %v741_v12, %v679_v10 }
 0x1bc   : > { %v798_v15 = vpop.f32.mrf.mxu0  ;;  %v818_v16 = vpop.f32.mrf.mxu1 }
 0x1bd   : > { %v821_v17 = vadd.f32 %v798_v15, %v744_v13  ;;  %v822_v18 = vadd.f32 %v818_v16, %v745_v14 }
 0x1bf   : > { %v823_v19 = vadd.f32 %v822_v18, %v821_v17  ;;  %v826_v20 = vmul.f32 %v821_v17, %v821_v17  ;;  %v827_v21 = vmul.f32 %v822_v18, %v822_v18 }
 0x1c1   : > { %824 = vadd.xlane.f32.xlu2 %v823_v19  ;;  %v828_v22 = vadd.f32 %v827_v21, %v826_v20 }
 0x1c3   : > { %829 = vadd.xlane.f32.xlu0 %v828_v22 }
 0x234   : > { %v825_v23 = vpop.xlane.xlu2 %824 }
 0x235   : > { %v831_v24 = vmul.f32 0.00390625, %v825_v23 }
 0x236   : > { %v830_v25 = vpop.xlane.xlu0 %829 }
 0x237   : > { %v832_v26 = vmul.f32 0.00390625, %v830_v25  ;;  %v833_v27 = vmul.f32 %v831_v24, %v831_v24  ;;  %v836_v37 = vsub.f32 %v821_v17, %v831_v24  ;;  %v837_v38 = vsub.f32 %v822_v18, %v831_v24 }
 0x239   : > { %v834_v28 = vsub.f32 %v832_v26, %v833_v27 }
 0x23b   : > { %v835_v29 = vmax.f32 %v834_v28, 0.0 }
 0x23d   : > { %v838_v30 = vadd.f32 1e-05, %v835_v29 }
 0x23f   : > { %1115 = vrsqrt.f32 %v838_v30  ;;  %vm845_vm0 = vweird.f32 %v838_v30 }
 0x245   : > { %v1116_v31 = vpop.eup %1115 }
 0x246   : > { %v840_v32 = vmul.f32 %v1116_v31, %v838_v30  ;;  %vm846_vm15 = vweird.f32 %v1116_v31 }
 0x247   : > { %vm847_vm1 = vmor %vm845_vm0, %vm846_vm15 }
 0x248   : > { %v841_v33 = vmul.f32 %v1116_v31, %v840_v32 }
 0x24a   : > { %v842_v34 = vmul.f32 0.5, %v841_v33 }
 0x24c   : > { %v843_v35 = vsub.f32 1.5, %v842_v34 }
 0x24e   : > { %v844_v36 = vmul.f32 %v1116_v31, %v843_v35 }
 0x250   : > { %v848_v39 = vsel %vm847_vm1, %v1116_v31, %v844_v36 }
 0x251   : > { %v1371_v40 = vmul.f32 %v848_v39, %v836_v37  ;;  %v1373_v41 = vmul.f32 %v848_v39, %v837_v38 }
 0x253   : > { %v851_v42 = vsub.f32 0.0, %v1371_v40  ;;  %v852_v43 = vsub.f32 0.0, %v1373_v41 }
 0x255   : > { %v853_v44 = vmul.f32 1.442695, %v851_v42  ;;  %v855_v45 = vmul.f32 1.442695, %v852_v43 }
 0x257   : > { %1117 = vpow2.f32 %v853_v44 }
 0x258   : > { %1119 = vpow2.f32 %v855_v45 }
 0x25d   : > { %v1118_v46 = vpop.eup %1117 }
 0x25e   : > { %v1120_v47 = vpop.eup %1119  ;;  %v857_v48 = vadd.f32 1.0, %v1118_v46 }
 0x25f   : > { %v858_v49 = vadd.f32 1.0, %v1120_v47 }
 0x260   : > { %1121 = vrcp.f32 %v857_v48  ;;  %v870_v55 = vand.u32 2147483648, %v857_v48  ;;  %v868_v58 = vand.u32 2147483647, %v857_v48  ;;  %vm864_vm4 = vweird.f32 %v857_v48 }
 0x261   : > { %1123 = vrcp.f32 %v858_v49  ;;  %v885_v59 = vand.u32 2147483648, %v858_v49  ;;  %v883_v61 = vand.u32 2147483647, %v858_v49  ;;  %vm879_vm6 = vweird.f32 %v858_v49 }
 0x262   : > { %v871_v63 = vor.u32 1.1754944e-38, %v870_v55  ;;  %vm869_vm7 = vcmp.eq.f32.partialorder %v868_v58, 8.507059e+37 }
 0x263   : > { %v886_v2 = vor.u32 1.1754944e-38, %v885_v59  ;;  %vm884_vm9 = vcmp.eq.f32.partialorder %v883_v61, 8.507059e+37 }
 0x266   : > { %v1122_v50 = vpop.eup %1121 }
 0x267   : > { %v1124_v51 = vpop.eup %1123  ;;  %v860_v52 = vmul.f32 %v1122_v50, %v857_v48  ;;  %vm865_vm2 = vweird.f32 %v1122_v50 }
 0x268   : > { %v875_v53 = vmul.f32 %v1124_v51, %v858_v49  ;;  %vm880_vm3 = vweird.f32 %v1124_v51  ;;  %vm866_vm5 = vmor %vm864_vm4, %vm865_vm2 }
 0x269   : > { %v861_v54 = vsub.f32 1.0, %v860_v52  ;;  %vm881_vm8 = vmor %vm879_vm6, %vm880_vm3 }
 0x26a   : > { %v876_v56 = vsub.f32 1.0, %v875_v53 }
 0x26b   : > { %v862_v57 = vmul.f32 %v1122_v50, %v861_v54 }
 0x26c   : > { %v877_v60 = vmul.f32 %v1124_v51, %v876_v56 }
 0x26d   : > { %v863_v62 = vadd.f32 %v1122_v50, %v862_v57 }
 0x26e   : > { %v878_v0 = vadd.f32 %v1124_v51, %v877_v60 }
 0x26f   : > { %v867_v1 = vsel %vm866_vm5, %v1122_v50, %v863_v62 }
 0x270   : > { %v872_v3 = vsel %vm869_vm7, %v871_v63, %v867_v1  ;;  %v882_v4 = vsel %vm881_vm8, %v1124_v51, %v878_v0 }
 0x271   : > { %v887_v5 = vsel %vm884_vm9, %v886_v2, %v882_v4  ;;  %v889_v6 = vadd.f32 2.0, %v872_v3 }
 0x272   : > { %v890_v7 = vadd.f32 2.0, %v887_v5 }
 0x273   : > { %v891_v8 = vmul.f32 %v889_v6, %v872_v3 }
 0x274   : > { %v892_v9 = vmul.f32 %v890_v7, %v887_v5 }
 0x275   : > { %v895_v10 = vadd.f32 2.0, %v891_v8  ;;  %v893_v27 = vmul.f32 %v891_v8, %v1371_v40 }
 0x276   : > { %v896_v11 = vadd.f32 2.0, %v892_v9  ;;  %v894_v30 = vmul.f32 %v892_v9, %v1373_v41 }
 0x277   : > { %1125 = vrcp.f32 %v895_v10  ;;  %v908_v17 = vand.u32 2147483648, %v895_v10  ;;  %v906_v20 = vand.u32 2147483647, %v895_v10  ;;  %vm902_vm12 = vweird.f32 %v895_v10 }
 0x278   : > { %1127 = vrcp.f32 %v896_v11  ;;  %v923_v21 = vand.u32 2147483648, %v896_v11  ;;  %v921_v23 = vand.u32 2147483647, %v896_v11  ;;  %vm917_vm14 = vweird.f32 %v896_v11 }
 0x279   : > { %v909_v25 = vor.u32 1.1754944e-38, %v908_v17  ;;  %vm907_vm15 = vcmp.eq.f32.partialorder %v906_v20, 8.507059e+37 }
 0x27a   : > { %v924_v29 = vor.u32 1.1754944e-38, %v923_v21  ;;  %vm922_vm1 = vcmp.eq.f32.partialorder %v921_v23, 8.507059e+37 }
 0x27d   : > { %v1126_v12 = vpop.eup %1125 }
 0x27e   : > { %v1128_v13 = vpop.eup %1127  ;;  %v898_v14 = vmul.f32 %v1126_v12, %v895_v10  ;;  %vm903_vm10 = vweird.f32 %v1126_v12 }
 0x27f   : > { %v913_v15 = vmul.f32 %v1128_v13, %v896_v11  ;;  %vm918_vm11 = vweird.f32 %v1128_v13  ;;  %vm904_vm13 = vmor %vm902_vm12, %vm903_vm10 }
 0x280   : > { %v899_v16 = vsub.f32 1.0, %v898_v14  ;;  %vm919_vm0 = vmor %vm917_vm14, %vm918_vm11 }
 0x281   : > { %v914_v18 = vsub.f32 1.0, %v913_v15 }
 0x282   : > { %v900_v19 = vmul.f32 %v1126_v12, %v899_v16 }
 0x283   : > { %v915_v22 = vmul.f32 %v1128_v13, %v914_v18 }
 0x284   : > { %v901_v24 = vadd.f32 %v1126_v12, %v900_v19 }
 0x285   : > { %v916_v26 = vadd.f32 %v1128_v13, %v915_v22 }
 0x286   : > { %v905_v28 = vsel %vm904_vm13, %v1126_v12, %v901_v24 }
 0x287   : > { %v910_v31 = vsel %vm907_vm15, %v909_v25, %v905_v28  ;;  %v920_v32 = vsel %vm919_vm0, %v1128_v13, %v916_v26 }
 0x288   : > { %v911_v33 = vmul.f32 %v910_v31, %v893_v27  ;;  %v925_v34 = vsel %vm922_vm1, %v924_v29, %v920_v32 }
 0x289   : > { %v926_v35 = vmul.f32 %v925_v34, %v894_v30 }
 0x28a   : > { %927 = vst [vmem:[%s163_s16] sm:$0xff] %v911_v33 }
 0x28b   : > { %928 = vst [vmem:[%s163_s16 + $0x8] sm:$0xff] %v926_v35 }
 0x28c   : > { %1156 = shalt.err (!%p1153_p3)
}
 0x28d   : > { %1063 = dma.vmem_to_hbm [thread:$0]  (%p1264_p5), %s944_s7, 256, %s946_s8, %s930_s9  }
 0x28e PF: > { %p1069_p4 = scmp.ge.s32.totalorder %s1191_s15, 2  ;;  %s957_s26 = sand.u32 1, %s1179_s12  }
 0x28f   : > { %s958_s27 = scalar_lea.sflag [#allocation3], %s957_s26 }
 0x290   : > { %p1066_p7 = pnand %p1069_p4, %p1268_p6 }
 0x292   : > { %p1067_p8 = pneg %p1066_p7 }
 0x294   : > { %1174 = dma.done.wait (%p1067_p8), %s958_s27, 256  }
 0x295   : > { %1176 = vsyncadd (%p1067_p8), %s958_s27, 4294967040  ;;  %p13_p9 = scmp.ge.s32.totalorder %s1251_s18, 4   ;;  %s1421_s12 = smov %s1183_s13 }
 0x296   : > { %s1422_s13 = smov %s1187_s14  ;;  %s1423_s14 = smov %s1262_s21 }
 0x297   : > { %s1424_s15 = smov %s1251_s18  ;;  %15 = sbr.rel (!%p13_p9) target bundleno = 3 (0x3), region = 84 }
 0x29c   :  { %964 = vsyncpa [#allocation3], 1 }
 0x29d   :  { %966 = vsyncpa [#allocation3 + $0x1], 1 }

</bundles_post_ra>
